<compile_context>
chip_gen: v7x
topology: tpu7x:2x2x1
jax: 0.10.0
libtpu: 0.0.40
codegen_flags: <defaults>
</compile_context>

<pallas_src>
import functools
import math

import jax
import jax.numpy as jnp
from jax.experimental import pallas as pl
from jax.experimental.pallas import tpu as pltpu


def _gcn_layer_kernel(adj_ref, x_ref, w_ref, b_ref, out_ref, acc_ref, *,
                      tk, alpha, apply_prelu):
    """One GCN layer, reassociated:  out = (adj @ x) @ w + b  [+ PReLU].

    adj_ref : (tm, tk)   bf16 tile, streamed over the (i, k) grid
    x_ref   : (N, fin)   bf16, VMEM-resident (constant block index), sliced here
    w_ref   : (fin, fout) f32  (small, resident)
    b_ref   : (1, fout)  f32
    acc_ref : (tm, fin)  f32 scratch accumulator
    """
    k = pl.program_id(1)

    @pl.when(k == 0)
    def _():
        acc_ref[...] = jnp.zeros_like(acc_ref)

    # Reduction step: accumulate adj_tile @ x_rows into the (tm, fin) scratch.
    off = pl.multiple_of(k * tk, tk)
    x_blk = x_ref[pl.ds(off, tk), :]
    acc_ref[...] += jnp.dot(adj_ref[...], x_blk,
                            preferred_element_type=jnp.float32)

    @pl.when(k == pl.num_programs(1) - 1)
    def _():
        # Finalize: small (tm, fin) x (fin, fout) f32 matmul, bias, activation.
        y = jnp.dot(acc_ref[...], w_ref[...],
                    preferred_element_type=jnp.float32) + b_ref[...]
        if apply_prelu:
            y = jnp.where(y > 0, y, alpha * y)
        out_ref[...] = y.astype(out_ref.dtype)


def _round_up(x, m):
    return ((x + m - 1) // m) * m


def _choose_tiles(n):
    # tk: large reduction tile over adj columns; multiple of 256, up to 1024.
    tk = min(1024, _round_up(n, 256))
    # tm: output-row tile; keep >= 2 row tiles so the "parallel" axis can be
    # sharded across both TensorCores on v7x.
    tm = 256 if _round_up(n, 256) >= 512 else 128
    return tm, tk


def _gcn_layer(adj_b, x_b, w, b, *, apply_prelu, alpha, out_dtype, tm, tk):
    """adj_b: (n_pad, n_pad) bf16; x_b: (n_pad, fin) bf16; w/b: f32."""
    n_pad = adj_b.shape[0]
    fin = x_b.shape[1]
    fout = w.shape[1]
    grid = (n_pad // tm, n_pad // tk)

    kernel = functools.partial(_gcn_layer_kernel, tk=tk, alpha=alpha,
                               apply_prelu=apply_prelu)
    return pl.pallas_call(
        kernel,
        out_shape=jax.ShapeDtypeStruct((n_pad, fout), out_dtype),
        grid_spec=pltpu.PrefetchScalarGridSpec(
            num_scalar_prefetch=0,
            grid=grid,
            in_specs=[
                # adj tile, streamed (double-buffered DMA) over (i, k).
                pl.BlockSpec((tm, tk), lambda i, k: (i, k)),
                # x: full-extent, constant block index -> fetched once,
                # resident in VMEM; sliced per-k inside the kernel.
                pl.BlockSpec((n_pad, fin), lambda i, k: (0, 0)),
                # weight + bias: tiny, resident f32 blocks.
                pl.BlockSpec((fin, fout), lambda i, k: (0, 0)),
                pl.BlockSpec((1, fout), lambda i, k: (0, 0)),
            ],
            out_specs=pl.BlockSpec((tm, fout), lambda i, k: (i, 0)),
            scratch_shapes=[pltpu.VMEM((tm, fin), jnp.float32)],
        ),
        compiler_params=pltpu.CompilerParams(
            dimension_semantics=("parallel", "arbitrary"),
            vmem_limit_bytes=32 * 1024 * 1024),
    )(adj_b, x_b, w, b)


def gcn2_forward(seq, adj, w1, w2, b1, b2, *, alpha=0.25, tm=None, tk=None):
    """GCN_2.forward for 2-D seq/adj (the torch.mm path)."""
    n = adj.shape[0]
    tm_d, tk_d = _choose_tiles(n)
    tm = tm_d if tm is None else tm
    tk = tk_d if tk is None else tk

    # Pad node count to a multiple of lcm(tm, tk).  Zero-padded adj columns /
    # x rows contribute nothing to real output rows; padded output rows are
    # sliced away at the end.
    n_pad = _round_up(n, (tm * tk) // math.gcd(tm, tk))
    pad = n_pad - n
    adj_b = jnp.pad(adj.astype(jnp.bfloat16), ((0, pad), (0, pad)))
    seq_b = jnp.pad(seq.astype(jnp.bfloat16), ((0, pad), (0, 0)))

    # Layer 1:  out1 = (adj @ seq) @ w1 + b1      (== adj @ (seq @ w1) + b1)
    out1 = _gcn_layer(adj_b, seq_b, w1, b1, apply_prelu=False, alpha=alpha,
                      out_dtype=jnp.bfloat16, tm=tm, tk=tk)
    # Layer 2:  out2 = PReLU((adj @ out1) @ w2 + b2)
    out2 = _gcn_layer(adj_b, out1, w2, b2, apply_prelu=True, alpha=alpha,
                      out_dtype=jnp.float32, tm=tm, tk=tk)
    return out2[:n]


def _xavier_uniform(key, fan_in, fan_out):
    # matches torch.nn.init.xavier_uniform_ bound for a Linear(fan_in, fan_out)
    bound = math.sqrt(6.0 / (fan_in + fan_out))
    # generated directly in (fan_in, fan_out) = PyTorch weight.T layout
    return jax.random.uniform(key, (fan_in, fan_out), jnp.float32,
                              minval=-bound, maxval=bound)


if __name__ == "__main__":
    # Small shapes consistent with the module.  N = 300 is deliberately NOT a
    # multiple of 128 so the padding / robust-tiling path is exercised.
    N = 300        # number of nodes
    in_ft = 128    # input feature dim
    out_ft = 128   # GCN_2 out_ft
    hid2 = 256     # fc2 output dim (hard-coded 256 in the module)

    key = jax.random.PRNGKey(0)
    k_seq, k_adj, k_w1, k_w2 = jax.random.split(key, 4)

    seq = jax.random.normal(k_seq, (N, in_ft), jnp.float32)
    adj = jax.random.normal(k_adj, (N, N), jnp.float32) * 0.1

    # Deterministic parameter init (xavier_uniform weights, zero biases,
    # PReLU default alpha = 0.25), mirroring the module's weights_init.
    w1 = _xavier_uniform(k_w1, in_ft, out_ft)      # fc.weight.T
    w2 = _xavier_uniform(k_w2, out_ft, hid2)       # fc2.weight.T
    b1 = jnp.zeros((1, out_ft), jnp.float32)       # self.bias
    b2 = jnp.zeros((1, hid2), jnp.float32)         # self.bias2

    # (a) default (auto) tiling, and (b) small explicit tiles so the
    # multi-step reduction / accumulator path is exercised (grid (3, 3)).
    out_auto = jax.block_until_ready(gcn2_forward(seq, adj, w1, w2, b1, b2))
    out_small = jax.block_until_ready(
        gcn2_forward(seq, adj, w1, w2, b1, b2, tm=128, tk=128))

    # Pure-JAX f32 reference in the ORIGINAL association (PyTorch order).
    ref1 = adj @ (seq @ w1) + b1
    ref2 = adj @ (ref1 @ w2) + b2
    ref = jnp.where(ref2 > 0, ref2, 0.25 * ref2)

    ok = True
    for out in (out_auto, out_small):
        ok &= out.shape == (N, hid2)
        # bf16 operands on adj/seq/out1 -> loose tolerance vs. the f32 ref.
        ok &= bool(jnp.allclose(out, ref, atol=1e-1, rtol=5e-2))
    # Both tilings must agree with each other tightly (same dtypes/math).
    ok &= bool(jnp.allclose(out_auto, out_small, atol=5e-3, rtol=5e-3))

    assert ok
    print("KERNEL_OK")
</pallas_src>

<mosaic_0001>
module attributes {stable_mosaic.version = 11 : i64} {
  func.func @_gcn_layer_kernel(%arg0: i32, %arg1: i32, %arg2: memref<256x512xbf16, #tpu.memory_space<vmem>>, %arg3: memref<512x128xbf16, #tpu.memory_space<vmem>>, %arg4: memref<128x128xf32, #tpu.memory_space<vmem>>, %arg5: memref<1x128xf32, #tpu.memory_space<vmem>>, %arg6: memref<256x128xbf16, #tpu.memory_space<vmem>>, %arg7: memref<256x128xf32, #tpu.memory_space<vmem>>) attributes {dimension_semantics = [#tpu.dimension_semantics<parallel>, #tpu.dimension_semantics<arbitrary>], iteration_bounds = array<i64: 2, 1>, scalar_prefetch = 0 : i64, scratch_operands = 1 : i64, tpu.core_type = #tpu.core_type<tc>, window_params = [{transform_indices = @transform_0, window_bounds = array<i64: 256, 512>}, {pipeline_mode = #tpu.pipeline_mode<synchronous>, transform_indices = @transform_1, window_bounds = array<i64: 512, 128>}, {pipeline_mode = #tpu.pipeline_mode<synchronous>, transform_indices = @transform_2, window_bounds = array<i64: 128, 128>}, {pipeline_mode = #tpu.pipeline_mode<synchronous>, transform_indices = @transform_3, window_bounds = array<i64: 1, 128>}, {transform_indices = @transform_4, window_bounds = array<i64: 256, 128>}]} {
    %c0_i32 = arith.constant 0 : i32
    %0 = arith.cmpi eq, %arg1, %c0_i32 : i32
    %1 = arith.extui %0 : i1 to i32
    %c0_i32_0 = arith.constant 0 : i32
    %2 = arith.cmpi ne, %1, %c0_i32_0 : i32
    scf.if %2 {
      %cst_9 = arith.constant 0.000000e+00 : f32
      %15 = vector.broadcast %cst_9 : f32 to vector<256x128xf32>
      %c0_10 = arith.constant 0 : index
      %c0_11 = arith.constant 0 : index
      %16 = vector.load %arg7[%c0_10, %c0_11] : memref<256x128xf32, #tpu.memory_space<vmem>>, vector<256x128xf32>
      tpu.vector_store %arg7[%c0_10, %c0_11], %15 {strides = array<i32>} : memref<256x128xf32, #tpu.memory_space<vmem>>, vector<256x128xf32>,
    } else {
    }
    %c512_i32 = arith.constant 512 : i32
    %3 = arith.muli %arg1, %c512_i32 : i32
    %4 = tpu.assume_multiple %3, 512 : i32
    %5 = arith.index_cast %4 : i32 to index
    %c0 = arith.constant 0 : index
    %6 = vector.load %arg3[%5, %c0] : memref<512x128xbf16, #tpu.memory_space<vmem>>, vector<512x128xbf16>
    %c0_1 = arith.constant 0 : index
    %c0_2 = arith.constant 0 : index
    %7 = vector.load %arg7[%c0_1, %c0_2] : memref<256x128xf32, #tpu.memory_space<vmem>>, vector<256x128xf32>
    %c0_3 = arith.constant 0 : index
    %c0_4 = arith.constant 0 : index
    %8 = vector.load %arg2[%c0_3, %c0_4] : memref<256x512xbf16, #tpu.memory_space<vmem>>, vector<256x512xbf16>
    %cst = arith.constant dense<0.000000e+00> : vector<256x128xf32>
    %9 = tpu.matmul %8, %6, %cst {dimension_numbers = #tpu.dot_dimension_numbers<[1], [0], [0], [1], [0, 0, 1, 1], [], []>} : vector<256x512xbf16>, vector<512x128xbf16>, vector<256x128xf32> -> vector<256x128xf32>
    %10 = arith.addf %7, %9 : vector<256x128xf32>
    %c0_5 = arith.constant 0 : index
    %c0_6 = arith.constant 0 : index
    %11 = vector.load %arg7[%c0_5, %c0_6] : memref<256x128xf32, #tpu.memory_space<vmem>>, vector<256x128xf32>
    tpu.vector_store %arg7[%c0_5, %c0_6], %10 {strides = array<i32>} : memref<256x128xf32, #tpu.memory_space<vmem>>, vector<256x128xf32>,
    %c0_i32_7 = arith.constant 0 : i32
    %12 = arith.cmpi eq, %arg1, %c0_i32_7 : i32
    %13 = arith.extui %12 : i1 to i32
    %c0_i32_8 = arith.constant 0 : i32
    %14 = arith.cmpi ne, %13, %c0_i32_8 : i32
    scf.if %14 {
      %c0_9 = arith.constant 0 : index
      %c0_10 = arith.constant 0 : index
      %15 = vector.load %arg7[%c0_9, %c0_10] : memref<256x128xf32, #tpu.memory_space<vmem>>, vector<256x128xf32>
      %c0_11 = arith.constant 0 : index
      %c0_12 = arith.constant 0 : index
      %16 = vector.load %arg4[%c0_11, %c0_12] : memref<128x128xf32, #tpu.memory_space<vmem>>, vector<128x128xf32>
      %cst_13 = arith.constant dense<0.000000e+00> : vector<256x128xf32>
      %17 = tpu.matmul %15, %16, %cst_13 {dimension_numbers = #tpu.dot_dimension_numbers<[1], [0], [0], [1], [0, 0, 1, 1], [], []>} : vector<256x128xf32>, vector<128x128xf32>, vector<256x128xf32> -> vector<256x128xf32>
      %c0_14 = arith.constant 0 : index
      %c0_15 = arith.constant 0 : index
      %18 = vector.load %arg5[%c0_14, %c0_15] : memref<1x128xf32, #tpu.memory_space<vmem>>, vector<1x128xf32>
      %19 = vector.broadcast %18 : vector<1x128xf32> to vector<256x128xf32>
      %20 = arith.addf %17, %19 : vector<256x128xf32>
      %21 = arith.truncf %20 : vector<256x128xf32> to vector<256x128xbf16>
      %c0_16 = arith.constant 0 : index
      %c0_17 = arith.constant 0 : index
      %22 = vector.load %arg6[%c0_16, %c0_17] : memref<256x128xbf16, #tpu.memory_space<vmem>>, vector<256x128xbf16>
      tpu.vector_store %arg6[%c0_16, %c0_17], %21 {strides = array<i32>} : memref<256x128xbf16, #tpu.memory_space<vmem>>, vector<256x128xbf16>,
    } else {
    }
    return
  }
  func.func @transform_0(%arg0: i32, %arg1: i32) -> (i32, i32) {
    %c0_i32 = arith.constant 0 : i32
    return %arg0, %arg1 : i32, i32
  }
  func.func @transform_1(%arg0: i32, %arg1: i32) -> (i32, i32) {
    %c0_i32 = arith.constant 0 : i32
    %c0_i32_0 = arith.constant 0 : i32
    %c0_i32_1 = arith.constant 0 : i32
    return %c0_i32, %c0_i32_0 : i32, i32
  }
  func.func @transform_2(%arg0: i32, %arg1: i32) -> (i32, i32) {
    %c0_i32 = arith.constant 0 : i32
    %c0_i32_0 = arith.constant 0 : i32
    %c0_i32_1 = arith.constant 0 : i32
    return %c0_i32, %c0_i32_0 : i32, i32
  }
  func.func @transform_3(%arg0: i32, %arg1: i32) -> (i32, i32) {
    %c0_i32 = arith.constant 0 : i32
    %c0_i32_0 = arith.constant 0 : i32
    %c0_i32_1 = arith.constant 0 : i32
    return %c0_i32, %c0_i32_0 : i32, i32
  }
  func.func @transform_4(%arg0: i32, %arg1: i32) -> (i32, i32) {
    %c0_i32 = arith.constant 0 : i32
    %c0_i32_0 = arith.constant 0 : i32
    return %arg0, %c0_i32 : i32, i32
  }
}

</mosaic_0001>

<bundles_post_ra>
// kernel: tpu_custom_call.1
= control target key start
LH: loop header
LB: loop body
LE: loop exit
PB: predicated region body
PF: predicated region fallthrough
CT: control target
= control target key end

     0   :  { %9 = vsyncpa [#allocation4], 0  ;;  %s3438_s0 = inlined_call_operand.hbm [shape: bf16[512,512], index: 0, kind: input, shape index: {}]   ;;  %s3439_s1 = inlined_call_operand.hbm [shape: bf16[512,128], index: 1, kind: input, shape index: {}]   ;;  %s3440_s2 = inlined_call_operand.hbm [shape: f32[128,128], index: 2, kind: input, shape index: {}]   ;;  %s3441_s3 = inlined_call_operand.vmem [shape: f32[1,128], index: 3, kind: input, shape index: {}]   ;;  %s3442_s4 = inlined_call_operand.hbm [shape: bf16[512,128], index: 4, kind: output, shape index: {}]  }
   0x1   :  { %11 = vsyncpa [#allocation4 + $0x1], 0 }
   0x2   :  { %12 = vsyncpa [#allocation7], 0 }
   0x3   :  { %13 = vsyncpa [#allocation5], 0 }
   0x4   :  { %15 = vsyncpa [#allocation5 + $0x1], 0  ;;  %s3036_s15 = smov 0   ;;  %s3038_s16 = smov 0  }
   0x5   :  { %s3040_s17 = smov 0   ;;  %s3042_s18 = smov 0  }
   0x6   :  { %s3044_s19 = smov 0   ;;  %s3046_s20 = smov 0  }
   0x7 LB: > { %s1927_s21 = sadd.s32 4294967295, %s2997_s20   ;;  %s1928_s22 = sadd.s32 4294967294, %s2997_s20   ;;  %s2997_s20 = sphi %s3046_s20, %s21_s20   ;;  %s2993_s19 = sphi %s3044_s19, %s3464_s19   ;;  %s2989_s18 = sphi %s3042_s18, %s3463_s18   ;;  %s2985_s17 = sphi %s3040_s17, %s3462_s17   ;;  %s2981_s16 = sphi %s3038_s16, %s3461_s16   ;;  %s2977_s15 = sphi %s3036_s15, %s3460_s15  }
   0x8   : > { %p55_p0 = scmp.ne.s32.totalorder %s2981_s16, %s2977_s15  ;;  %p3070_p1 = scmp.eq.s32.totalorder %s1927_s21, 0 }
   0x9   : > { %p3074_p2 = scmp.eq.s32.totalorder %s1927_s21, 1  ;;  %p148_p3 = scmp.eq.s32.totalorder %s1928_s22, 1 }
   0xa   : > { %s3447_s23 = scalar_select %p3070_p1, 1, 0 }
   0xb   : > { %p3080_p4 = por %p3070_p1, %p55_p0  ;;  %p1929_p5 = scmp.ge.s32.totalorder %s2997_s20, 1 }
   0xc   : > { %p3085_p6 = por %p148_p3, %p55_p0  ;;  %p155_p7 = scmp.lt.s32.totalorder %s2997_s20, 3 }
   0xd   : > { %s3449_s25 = scalar_select %p3080_p4, 1, 0 }
   0xe   : > { %s3450_s26 = scalar_select %p3085_p6, 1, 0 }
   0xf   : > { %p3090_p8 = pnand %p1929_p5, %p155_p7  ;;  %s2999_s28 = smov [#allocation6]  }
  0x10   : > { %s167_s29 = sshll.u32 %s2999_s28, 4  ;;  %s3000_s5 = smov [#allocation8]   ;;  %s3094_s29 = int_to_ptr.vmem [resolvable:$true] %s167_s29 }
  0x11   : > { %p2618_p9 = pneg %p3090_p8  ;;  %s180_s6 = sshll.u32 %s3000_s5, 4  ;;  %s3105_s6 = int_to_ptr.vmem [resolvable:$true] %s180_s6 }
  0x12   : > { %s2825_s9 = scalar_lea.hbm %s3439_s1, 4096 }
  0x13   : > { %p3101_p11 = pnand %p2618_p9, %p3070_p1  ;;  %p2826_p12 = scmp.ne.s32.totalorder %s3439_s1, %s2825_s9 }
  0x14   : > { %p2832_p5 = scmp.lt.u32.totalorder %s2825_s9, %s3439_s1 }
  0x15   : > { %p2827_p13 = pneg %p3101_p11 }
  0x17   : > { %p2828_p0 = pnand %p2827_p13, %p2826_p12 }
  0x19   : > { %p2829_p3 = pneg %p2828_p0 }
  0x1b   : > { %p2834_p7 = pnand %p2832_p5, %p2829_p3 }
  0x1d   : > { %2837 = shalt.err (!%p2834_p7)
}
  0x1e   : > { %s2838_s14 = scalar_lea.vmem %s3094_s29, 4096  ;;  %p2846_p1 = scmp.lt.s32.totalorder %s3094_s29, %s3094_s29 }
  0x1f   : > { %p2839_p9 = scmp.ne.s32.totalorder %s3094_s29, %s2838_s14  ;;  %p2847_p12 = scmp.lt.s32.totalorder %s2838_s14, %s2838_s14 }
  0x21   : > { %p2841_p10 = pnand %p2839_p9, %p2827_p13  ;;  %p2848_p0 = por %p2847_p12, %p2846_p1 }
  0x23   : > { %p2842_p6 = pneg %p2841_p10 }
  0x25   : > { %p2849_p4 = pnand %p2848_p0, %p2842_p6 }
  0x27   : > { %2852 = shalt.err (!%p2849_p4)
}
  0x28   : > { %s3001_s21 = smov 64   ;;  %s3002_s22 = smov 4  }
  0x29   : > { %2621 = dma.hbm_to_vmem [thread:$0]  (!%p3101_p11), %s3439_s1, 4096, %s3094_s29, [#allocation7], %s3001_s21, %s3001_s21, %s3002_s22  }
  0x2a   : > { %s2853_s9 = scalar_lea.hbm %s3440_s2, 2048 }
  0x2b   : > { %p2854_p1 = scmp.ne.s32.totalorder %s3440_s2, %s2853_s9  ;;  %p2860_p10 = scmp.lt.u32.totalorder %s2853_s9, %s3440_s2 }
  0x2d   : > { %p2856_p4 = pnand %p2854_p1, %p2827_p13 }
  0x2f   : > { %p2857_p6 = pneg %p2856_p4 }
  0x31   : > { %p2862_p3 = pnand %p2860_p10, %p2857_p6 }
  0x33   : > { %2865 = shalt.err (!%p2862_p3)
}
  0x34   : > { %s2866_s29 = scalar_lea.vmem %s3105_s6, 2048  ;;  %p2874_p12 = scmp.lt.s32.totalorder %s3105_s6, %s3105_s6 }
  0x35   : > { %p2867_p5 = scmp.ne.s32.totalorder %s3105_s6, %s2866_s29  ;;  %p2875_p0 = scmp.lt.s32.totalorder %s2866_s29, %s2866_s29 }
  0x37   : > { %p2869_p7 = pnand %p2867_p5, %p2827_p13  ;;  %p2876_p1 = por %p2875_p0, %p2874_p12 }
  0x39   : > { %p2870_p9 = pneg %p2869_p7 }
  0x3b   : > { %p2877_p4 = pnand %p2876_p1, %p2870_p9 }
  0x3d   : > { %2880 = shalt.err (!%p2877_p4)
}
  0x3e   : > { %s3003_s14 = smov 128   ;;  %s3004_s21 = smov 8  }
  0x3f   : > { %2624 = dma.hbm_to_vmem [thread:$0]  (!%p3101_p11), %s3440_s2, 2048, %s3105_s6, [#allocation7], %s3003_s14, %s3003_s14, %s3004_s21  }
  0x40   : > { %s33_s5 = sadd.s32 1, %s2993_s19  ;;  %s42_s7 = sadd.s32 1, %s2985_s17 }
  0x41   : > { %p35_p13 = scmp.ge.s32.totalorder %s33_s5, 2  ;;  %p49_p6 = scmp.ne.s32.totalorder %s2985_s17, %s2981_s16 }
  0x42   : > { %p50_p10 = scmp.eq.s32.totalorder %s2997_s20, 0  ;;  %p2635_p3 = scmp.lt.s32.totalorder %s2997_s20, 2 }
  0x43   : > { %s3466_s5 = smov (%p35_p13, %s33_s5), 0  ;;  %p3169_p7 = por %p3074_p2, %p49_p6 }
  0x44   : > { %p51_p5 = por %p50_p10, %p49_p6  ;;  %s37_s30 = ssub.s32 %s2993_s19, %s3466_s5 }
  0x45   : > { %s3453_s8 = scalar_select %p3169_p7, 1, 0 }
  0x46   : > { %s197_s9 = sand.u32 1, %s2985_s17   ;;  %p40_p9 = scmp.eq.s32.totalorder %s37_s30, 0 }
  0x47   : > { %s1933_s6 = sshll.u32 %s197_s9, 9  ;;  %s2077_s10 = sshll.u32 %s2993_s19, 13 }
  0x48   : > { %s3178_s11 = scalar_select %p40_p9, %s2985_s17, %s42_s7  }
  0x49   : > { %s3183_s29 = scalar_lea.hbm %s3438_s0, %s2077_s10  ;;  %s201_s24 = scalar_lea.vmem [#allocation3], %s1933_s6 }
  0x4a   : > { %s211_s14 = sshll.u32 %s201_s24, 4  ;;  %p3187_p2 = pnand %p2635_p3, %p51_p5  ;;  %s3191_s14 = int_to_ptr.vmem [resolvable:$true] %s211_s14 }
  0x4b   : > { %s3193_s22 = scalar_lea.sflag [#allocation4], %s197_s9  ;;  %s2881_s28 = scalar_lea.hbm %s3183_s29, 8192 }
  0x4c   : > { %p2882_p11 = scmp.ne.s32.totalorder %s3183_s29, %s2881_s28  ;;  %p2883_p12 = pneg %p3187_p2 }
  0x4d   : > { %s2886_s6 = scalar_lea.hbm %s3438_s0, 16384  ;;  %p2887_p4 = scmp.lt.u32.totalorder %s3183_s29, %s3438_s0 }
  0x4e   : > { %p2884_p0 = pnand %p2883_p12, %p2882_p11  ;;  %p2888_p13 = scmp.lt.u32.totalorder %s2886_s6, %s2881_s28 }
  0x4f   : > { %p2890_p10 = scmp.lt.u32.totalorder %s2881_s28, %s3183_s29 }
  0x50   : > { %p2885_p1 = pneg %p2884_p0  ;;  %p2889_p6 = por %p2888_p13, %p2887_p4 }
  0x52   : > { %p2891_p3 = por %p2890_p10, %p2889_p6 }
  0x54   : > { %p2892_p5 = pnand %p2891_p3, %p2885_p1 }
  0x56   : > { %2895 = shalt.err (!%p2892_p5)
}
  0x57   : > { %s2896_s9 = scalar_lea.vmem %s3191_s14, 8192  ;;  %s3005_s13 = smov [#allocation3]  }
  0x58   : > { %p2897_p9 = scmp.ne.s32.totalorder %s3191_s14, %s2896_s9  ;;  %s2901_s24 = sshll.u32 %s3005_s13, 4  ;;  %s2902_s24 = int_to_ptr.vmem [resolvable:$false] %s2901_s24 }
  0x59   : > { %s2903_s7 = scalar_lea.vmem %s2902_s24, 16384  ;;  %p2904_p7 = scmp.lt.s32.totalorder %s3191_s14, %s2902_s24 }
  0x5a   : > { %p2899_p11 = pnand %p2897_p9, %p2883_p12  ;;  %p2905_p4 = scmp.lt.s32.totalorder %s2903_s7, %s2896_s9 }
  0x5c   : > { %p2900_p0 = pneg %p2899_p11  ;;  %p2906_p13 = por %p2905_p4, %p2904_p7 }
  0x5e   : > { %p2907_p6 = pnand %p2906_p13, %p2900_p0 }
  0x60   : > { %2910 = shalt.err (!%p2907_p6)
}
  0x61   : > { %s3006_s28 = smov 256   ;;  %s3007_s30 = smov 16  }
  0x62   : > { %2628 = dma.hbm_to_vmem [thread:$0]  (!%p3187_p2), %s3183_s29, 8192, %s3191_s14, %s3193_s22, %s3006_s28, %s3006_s28, %s3007_s30  }
  0x63   : > { %223 = sbr.rel (%p3090_p8) target bundleno = 746 (0x2ea), region = 36  ;;  %s3224_s6 = sand.u32 (!%p3090_p8), 1, %s2981_s16  }
  0x64   : > { %s1938_s10 = sshll.u32 (!%p3090_p8), %s3224_s6, 9  ;;  %s226_s12 = scalar_lea.sflag (!%p3090_p8), [#allocation4], %s3224_s6 }
  0x65   : > { %s3228_s9 = scalar_lea.vmem (!%p3090_p8), [#allocation3], %s1938_s10  ;;  %p3455_p7 = scmp.ne.s32.totalorder (!%p3090_p8), %s3449_s25, 0 }
  0x6a   : > { %2964 = dma.done.wait (%p3455_p7), %s226_s12, 8192  }
  0x6b   : > { %2966 = vsyncadd (%p3455_p7), %s226_s12, 4294959104  ;;  %p3456_p2 = scmp.ne.s32.totalorder %s3447_s23, 0 }
  0x6d   : > { %2968 = dma.done.wait (%p3456_p2), [#allocation7], 6144  }
  0x6e   : > { %2970 = vsyncadd (%p3456_p2), [#allocation7], 4294961152  ;;  %v2697_v0 = vld [vmem:[#allocation6 + $0x40] sm:$0xff]   ;;  %v2699_v2 = vld [vmem:[#allocation6 + $0x48] sm:$0xff]   ;;  %s1941_s27 = sshll.u32 %s3224_s6, 7  ;;  %s2110_s14 = sshll.u32 %s2989_s18, 11 }
  0x6f   : > { %v2698_v1 = vld [vmem:[#allocation6] sm:$0xff]   ;;  %2590 = vmatprep.subr.bf16.mxu1 %v2697_v0  ;;  %2206 = vmatprep.subr.bf16.mxu0 %v2697_v0  ;;  %v2700_v3 = vld [vmem:[#allocation6 + $0x8] sm:$0xff]   ;;  %v2701_v4 = vld [vmem:[#allocation6 + $0x50] sm:$0xff]   ;;  %s3334_s29 = scalar_lea.vmem [#allocation9], %s1941_s27  ;;  %s3386_s24 = scalar_lea.hbm %s3442_s4, %s2110_s14 }
  0x70   : > { %2598 = vmatpush3.bf16.msra.mxu1 %v2698_v1  ;;  %2207 = vmatpush3.bf16.msra.mxu0 %v2698_v1  ;;  %v2702_v5 = vld [vmem:[#allocation6 + $0x10] sm:$0xff]   ;;  %v2703_v6 = vld [vmem:[#allocation6 + $0x58] sm:$0xff]   ;;  %v2705_v8 = vld [vmem:[#allocation6 + $0x60] sm:$0xff]   ;;  %s1822_s21 = sshll.u32 %s3334_s29, 4  ;;  %s1809_s7 = scalar_lea.sflag [#allocation5], %s3224_s6  ;;  %s3388_s21 = int_to_ptr.vmem [resolvable:$true] %s1822_s21 }
  0x71   : > { %2591 = vmatprep.subr.bf16.mxu1 %v2699_v2  ;;  %2208 = vmatprep.subr.bf16.mxu0 %v2699_v2  ;;  %v2704_v7 = vld [vmem:[#allocation6 + $0x18] sm:$0xff]   ;;  %v2706_v9 = vld [vmem:[#allocation6 + $0x20] sm:$0xff]   ;;  %v2707_v10 = vld [vmem:[#allocation6 + $0x68] sm:$0xff]   ;;  %s2911_s18 = scalar_lea.vmem %s3388_s21, 2048  ;;  %p3457_p12 = scmp.ne.s32.totalorder %s3453_s8, 0 }
  0x72   : > { %v2715_v11 = vld [vmem:[%s3228_s9 + $0x184] ss:$16 sps:$4 sm:$0xff]   ;;  %v2708_v12 = vld [vmem:[#allocation6 + $0x28] sm:$0xff]   ;;  %v2711_v15 = vld [vmem:[#allocation6 + $0x78] sm:$0xff]   ;;  %p2912_p8 = scmp.ne.s32.totalorder %s3388_s21, %s2911_s18  ;;  %s3008_s28 = smov [#allocation9]  }
  0x73   : > { %1107 = vmatprep.mubr.bf16.mxu1 %v2715_v11  ;;  %v2709_v13 = vld [vmem:[#allocation6 + $0x70] sm:$0xff]   ;;  %v2712_v16 = vld [vmem:[#allocation6 + $0x38] sm:$0xff]   ;;  %v2716_v17 = vld [vmem:[#allocation6 + $0xc0] sm:$0xff]   ;;  %s2915_s30 = sshll.u32 %s3008_s28, 4  ;;  %s2916_s30 = int_to_ptr.vmem [resolvable:$false] %s2915_s30 }
  0x74   : > { %2599 = vmatpush3.bf16.msra.mxu1 %v2700_v3  ;;  %2209 = vmatpush3.bf16.msra.mxu0 %v2700_v3  ;;  %v2710_v14 = vld [vmem:[#allocation6 + $0x30] sm:$0xff]   ;;  %v2717_v19 = vld [vmem:[#allocation6 + $0x80] sm:$0xff]   ;;  %v2718_v21 = vld [vmem:[#allocation6 + $0xc8] sm:$0xff]   ;;  %p2913_p1 = pnand %p2912_p8, %p3457_p12  ;;  %s2917_s10 = scalar_lea.vmem %s2916_s30, 4096 }
  0x75   : > { %2592 = vmatprep.subr.bf16.mxu1 %v2701_v4  ;;  %2210 = vmatprep.subr.bf16.mxu0 %v2701_v4  ;;  %v2713_v18 = vld [vmem:[%s3228_s9 + $0x180] ss:$16 sps:$4 sm:$0xff]   ;;  %v2720_v20 = vld [vmem:[%s3228_s9 + $0x1a4] ss:$16 sps:$4 sm:$0xff]   ;;  %v2719_v22 = vld [vmem:[#allocation6 + $0x88] sm:$0xff]   ;;  %p2918_p3 = scmp.lt.s32.totalorder %s3388_s21, %s2916_s30  ;;  %p2919_p5 = scmp.lt.s32.totalorder %s2917_s10, %s2911_s18 }
  0x76   : > { %v2722_v23 = vld [vmem:[%s3228_s9 + $0x1a0] ss:$16 sps:$4 sm:$0xff]   ;;  %v2743_v27 = vld [vmem:[%s3228_s9 + $0x4] ss:$16 sps:$4 sm:$0xff]   ;;  %v2725_v28 = vld [vmem:[#allocation6 + $0xd8] sm:$0xff]   ;;  %p2914_p10 = pneg %p2913_p1 }
  0x77   : > { %v2723_v24 = vld [vmem:[#allocation6 + $0xd0] sm:$0xff]   ;;  %1011 = vmatprep.mubr.bf16.mxu0 %v2743_v27  ;;  %v2726_v31 = vld [vmem:[#allocation6 + $0x98] sm:$0xff]   ;;  %v2730_v33 = vld [vmem:[#allocation6 + $0xe0] sm:$0xff]   ;;  %p2920_p9 = por %p2919_p5, %p2918_p3 }
  0x78   : > { %2600 = vmatpush3.bf16.msra.mxu1 %v2702_v5  ;;  %2211 = vmatpush3.bf16.msra.mxu0 %v2702_v5  ;;  %v2724_v25 = vld [vmem:[#allocation6 + $0x90] sm:$0xff]   ;;  %v2731_v36 = vld [vmem:[#allocation6 + $0xa0] sm:$0xff]   ;;  %v2732_v38 = vld [vmem:[#allocation6 + $0xe8] sm:$0xff]  }
  0x79   : > { %2593 = vmatprep.subr.bf16.mxu1 %v2703_v6  ;;  %2212 = vmatprep.subr.bf16.mxu0 %v2703_v6  ;;  %v2741_v26 = vld [vmem:[%s3228_s9] ss:$16 sps:$4 sm:$0xff]   ;;  %v2727_v29 = vld [vmem:[%s3228_s9 + $0x1c4] ss:$16 sps:$4 sm:$0xff]   ;;  %v2733_v39 = vld [vmem:[#allocation6 + $0xa8] sm:$0xff]   ;;  %p2921_p11 = pnand %p2920_p9, %p2914_p10 }
  0x7a   : > { %v2747_v30 = vld [vmem:[%s3228_s9 + $0x24] ss:$16 sps:$4 sm:$0xff]   ;;  %v2729_v32 = vld [vmem:[%s3228_s9 + $0x1c0] ss:$16 sps:$4 sm:$0xff]   ;;  %v2746_v45 = vld [vmem:[%s3228_s9 + $0xc] ss:$16 sps:$4 sm:$0xff]  }
  0x7b   : > { %v2751_v34 = vld [vmem:[%s3228_s9 + $0x20] ss:$16 sps:$4 sm:$0xff]   ;;  %v2753_v35 = vld [vmem:[%s3228_s9 + $0x44] ss:$16 sps:$4 sm:$0xff]   ;;  %v2739_v46 = vld [vmem:[#allocation6 + $0xf8] sm:$0xff]  }
  0x7c   : > { %2601 = vmatpush3.bf16.msra.mxu1 %v2704_v7  ;;  %2213 = vmatpush3.bf16.msra.mxu0 %v2704_v7  ;;  %v2734_v37 = vld [vmem:[%s3228_s9 + $0x1e4] ss:$16 sps:$4 sm:$0xff]   ;;  %v2736_v40 = vld [vmem:[%s3228_s9 + $0x1e0] ss:$16 sps:$4 sm:$0xff]   ;;  %v2740_v47 = vld [vmem:[#allocation6 + $0xb8] sm:$0xff]  }
  0x7d   : > { %2594 = vmatprep.subr.bf16.mxu1 %v2705_v8  ;;  %2214 = vmatprep.subr.bf16.mxu0 %v2705_v8  ;;  %v2737_v41 = vld [vmem:[#allocation6 + $0xf0] sm:$0xff]   ;;  %v2744_v48 = vld [vmem:[%s3228_s9 + $0x8] ss:$16 sps:$4 sm:$0xff]   ;;  %v2749_v51 = vld [vmem:[%s3228_s9 + $0x2c] ss:$16 sps:$4 sm:$0xff]  }
  0x7e   : > { %v2757_v42 = vld [vmem:[%s3228_s9 + $0x40] ss:$16 sps:$4 sm:$0xff]   ;;  %v2759_v43 = vld [vmem:[%s3228_s9 + $0x64] ss:$16 sps:$4 sm:$0xff]   ;;  %v2752_v53 = vld [vmem:[%s3228_s9 + $0x28] ss:$16 sps:$4 sm:$0xff]  }
  0x7f   : > { %v2738_v44 = vld [vmem:[#allocation6 + $0xb0] sm:$0xff]   ;;  %v2755_v55 = vld [vmem:[%s3228_s9 + $0x4c] ss:$16 sps:$4 sm:$0xff]   ;;  %v2758_v57 = vld [vmem:[%s3228_s9 + $0x48] ss:$16 sps:$4 sm:$0xff]  }
  0x80   : > { %2602 = vmatpush3.bf16.msra.mxu1 %v2706_v9  ;;  %2215 = vmatpush3.bf16.msra.mxu0 %v2706_v9  ;;  %v2763_v49 = vld [vmem:[%s3228_s9 + $0x60] ss:$16 sps:$4 sm:$0xff]   ;;  %v2765_v50 = vld [vmem:[%s3228_s9 + $0x84] ss:$16 sps:$4 sm:$0xff]   ;;  %v2761_v59 = vld [vmem:[%s3228_s9 + $0x6c] ss:$16 sps:$4 sm:$0xff]  }
  0x81   : > { %2595 = vmatprep.subr.bf16.mxu1 %v2707_v10  ;;  %2216 = vmatprep.subr.bf16.mxu0 %v2707_v10  ;;  %v2769_v52 = vld [vmem:[%s3228_s9 + $0x80] ss:$16 sps:$4 sm:$0xff]   ;;  %v2771_v54 = vld [vmem:[%s3228_s9 + $0xa4] ss:$16 sps:$4 sm:$0xff]   ;;  %v2764_v61 = vld [vmem:[%s3228_s9 + $0x68] ss:$16 sps:$4 sm:$0xff]  }
  0x82   : > { %v2775_v56 = vld [vmem:[%s3228_s9 + $0xa0] ss:$16 sps:$4 sm:$0xff]   ;;  %v2777_v58 = vld [vmem:[%s3228_s9 + $0xc4] ss:$16 sps:$4 sm:$0xff]   ;;  %v2767_v63 = vld [vmem:[%s3228_s9 + $0x8c] ss:$16 sps:$4 sm:$0xff]  }
  0x83   : > { %v2781_v60 = vld [vmem:[%s3228_s9 + $0xc0] ss:$16 sps:$4 sm:$0xff]   ;;  %v2783_v62 = vld [vmem:[%s3228_s9 + $0xe4] ss:$16 sps:$4 sm:$0xff]   ;;  %v2770_v1 = vld [vmem:[%s3228_s9 + $0x88] ss:$16 sps:$4 sm:$0xff]  }
  0x84   : > { %2603 = vmatpush3.bf16.msra.mxu1 %v2708_v12  ;;  %2217 = vmatpush3.bf16.msra.mxu0 %v2708_v12  ;;  %v2787_v0 = vld [vmem:[%s3228_s9 + $0xe0] ss:$16 sps:$4 sm:$0xff]   ;;  %v2789_v2 = vld [vmem:[%s3228_s9 + $0x104] ss:$16 sps:$4 sm:$0xff]   ;;  %v2773_v3 = vld [vmem:[%s3228_s9 + $0xac] ss:$16 sps:$4 sm:$0xff]  }
  0x85   : > { %2596 = vmatprep.subr.bf16.mxu1 %v2709_v13  ;;  %2218 = vmatprep.subr.bf16.mxu0 %v2709_v13  ;;  %v2793_v4 = vld [vmem:[%s3228_s9 + $0x100] ss:$16 sps:$4 sm:$0xff]   ;;  %v2776_v5 = vld [vmem:[%s3228_s9 + $0xa8] ss:$16 sps:$4 sm:$0xff]   ;;  %v2795_v6 = vld [vmem:[%s3228_s9 + $0x124] ss:$16 sps:$4 sm:$0xff]  }
  0x86   : > { %v2779_v7 = vld [vmem:[%s3228_s9 + $0xcc] ss:$16 sps:$4 sm:$0xff]   ;;  %v2799_v8 = vld [vmem:[%s3228_s9 + $0x120] ss:$16 sps:$4 sm:$0xff]   ;;  %v2782_v9 = vld [vmem:[%s3228_s9 + $0xc8] ss:$16 sps:$4 sm:$0xff]  }
  0x87   : > { %v2801_v10 = vld [vmem:[%s3228_s9 + $0x144] ss:$16 sps:$4 sm:$0xff]   ;;  %v2785_v11 = vld [vmem:[%s3228_s9 + $0xec] ss:$16 sps:$4 sm:$0xff]   ;;  %v2805_v12 = vld [vmem:[%s3228_s9 + $0x140] ss:$16 sps:$4 sm:$0xff]  }
  0x88   : > { %2604 = vmatpush3.bf16.msra.mxu1 %v2710_v14  ;;  %2219 = vmatpush3.bf16.msra.mxu0 %v2710_v14  ;;  %v2788_v13 = vld [vmem:[%s3228_s9 + $0xe8] ss:$16 sps:$4 sm:$0xff]   ;;  %v2807_v14 = vld [vmem:[%s3228_s9 + $0x164] ss:$16 sps:$4 sm:$0xff]  }
  0x89   : > { %2597 = vmatprep.subr.bf16.mxu1 %v2711_v15  ;;  %2220 = vmatprep.subr.bf16.mxu0 %v2711_v15  ;;  %v2791_v15 = vld [vmem:[%s3228_s9 + $0x10c] ss:$16 sps:$4 sm:$0xff]  }
  0x8c   : > { %2605 = vmatpush3.bf16.msra.mxu1 %v2712_v16  ;;  %2221 = vmatpush3.bf16.msra.mxu0 %v2712_v16  ;;  %v1400_v16 = vld [vmem:[#allocation8] sm:$0xff] }
  0x8d   : > { %2318 = vmatprep.subr.bf16.mxu1 %v2716_v17  ;;  %v1401_v17 = vld [vmem:[#allocation8 + $0x8] sm:$0xff] }
  0x8f   : > { %1108 = vmatmul.mubr.bf16.vlgmr.msra.gmra.mrb[0].mxu1 %v2713_v18  ;;  %1012 = vmatmul.mubr.bf16.vlgmr.msra.gmra.mrb[0].mxu0 %v2741_v26  ;;  %v2558_v18 = vpack.c.bf16 %v1401_v17, %v1400_v16  ;;  %v1405_v26 = vld [vmem:[#allocation8 + $0x28] sm:$0xff] }
  0x90   : > { %2319 = vmatpush3.bf16.msra.mxu1 %v2717_v19  ;;  %1115 = vmatprep.mubr.bf16.mxu1 %v2720_v20  ;;  %v2811_v19 = vld [vmem:[%s3228_s9 + $0x160] ss:$16 sps:$4 sm:$0xff]   ;;  %v2794_v20 = vld [vmem:[%s3228_s9 + $0x108] ss:$16 sps:$4 sm:$0xff]  }
  0x91   : > { %2320 = vmatprep.subr.bf16.mxu1 %v2718_v21  ;;  %1019 = vmatprep.mubr.bf16.mxu0 %v2747_v30  ;;  %v1402_v21 = vld [vmem:[#allocation8 + $0x10] sm:$0xff]  ;;  %v1407_v30 = vld [vmem:[#allocation8 + $0x38] sm:$0xff] }
  0x92   : > { %2559 = vmatprep.subr.bf16.mxu0 %v2558_v18 }
  0x93   : > { %2561 = vmatpush3.bf16.msra.mxu0 %v2558_v18 }
  0x94   : > { %2321 = vmatpush3.bf16.msra.mxu1 %v2719_v22  ;;  %v1403_v22 = vld [vmem:[#allocation8 + $0x18] sm:$0xff] }
  0x95   : > { %2322 = vmatprep.subr.bf16.mxu1 %v2723_v24  ;;  %v2562_v24 = vpack.c.bf16 %v1403_v22, %v1402_v21 }
  0x97   : > { %1116 = vmatmul.mubr.bf16.gmra.mrb[4].mxu1 %v2722_v23  ;;  %1020 = vmatmul.mubr.bf16.gmra.mrb[4].mxu0 %v2751_v34  ;;  %v2797_v23 = vld [vmem:[%s3228_s9 + $0x12c] ss:$16 sps:$4 sm:$0xff]  }
  0x98   : > { %2323 = vmatpush3.bf16.msra.mxu1 %v2724_v25  ;;  %1123 = vmatprep.mubr.bf16.mxu1 %v2727_v29  ;;  %v1404_v25 = vld [vmem:[#allocation8 + $0x20] sm:$0xff]  ;;  %v1406_v29 = vld [vmem:[#allocation8 + $0x30] sm:$0xff]  ;;  %v1409_v34 = vld [vmem:[#allocation8 + $0x48] sm:$0xff] }
  0x99   : > { %2324 = vmatprep.subr.bf16.mxu1 %v2725_v28  ;;  %1027 = vmatprep.mubr.bf16.mxu0 %v2753_v35  ;;  %v2566_v27 = vpack.c.bf16 %v1405_v26, %v1404_v25  ;;  %v2800_v28 = vld [vmem:[%s3228_s9 + $0x128] ss:$16 sps:$4 sm:$0xff]  }
  0x9a   : > { %2563 = vmatprep.subr.bf16.mxu0 %v2562_v24 }
  0x9b   : > { %2565 = vmatpush3.bf16.msra.mxu0 %v2562_v24 }
  0x9c   : > { %2325 = vmatpush3.bf16.msra.mxu1 %v2726_v31  ;;  %2567 = vmatprep.subr.bf16.mxu0 %v2566_v27  ;;  %v2803_v31 = vld [vmem:[%s3228_s9 + $0x14c] ss:$16 sps:$4 sm:$0xff]  }
  0x9d   : > { %2326 = vmatprep.subr.bf16.mxu1 %v2730_v33  ;;  %v1408_v33 = vld [vmem:[#allocation8 + $0x40] sm:$0xff] }
  0x9e   : > { %v2574_v35 = vpack.c.bf16 %v1409_v34, %v1408_v33 }
  0x9f   : > { %1124 = vmatmul.mubr.bf16.gmra.mrb[8].mxu1 %v2729_v32  ;;  %1028 = vmatmul.mubr.bf16.gmra.mrb[8].mxu0 %v2757_v42  ;;  %v2570_v32 = vpack.c.bf16 %v1407_v30, %v1406_v29  ;;  %v1413_v42 = vld [vmem:[#allocation8 + $0x68] sm:$0xff] }
  0xa0   : > { %2327 = vmatpush3.bf16.msra.mxu1 %v2731_v36  ;;  %1131 = vmatprep.mubr.bf16.mxu1 %v2734_v37  ;;  %v2806_v36 = vld [vmem:[%s3228_s9 + $0x148] ss:$16 sps:$4 sm:$0xff]   ;;  %v1410_v37 = vld [vmem:[#allocation8 + $0x50] sm:$0xff] }
  0xa1   : > { %2328 = vmatprep.subr.bf16.mxu1 %v2732_v38  ;;  %1035 = vmatprep.mubr.bf16.mxu0 %v2759_v43  ;;  %v1411_v38 = vld [vmem:[#allocation8 + $0x58] sm:$0xff] }
  0xa2   : > { %2569 = vmatpush3.bf16.msra.mxu0 %v2566_v27 }
  0xa3   : > { %2571 = vmatprep.subr.bf16.mxu0 %v2570_v32 }
  0xa4   : > { %2329 = vmatpush3.bf16.msra.mxu1 %v2733_v39  ;;  %v2809_v39 = vld [vmem:[%s3228_s9 + $0x16c] ss:$16 sps:$4 sm:$0xff]  }
  0xa5   : > { %2330 = vmatprep.subr.bf16.mxu1 %v2737_v41  ;;  %v1412_v41 = vld [vmem:[#allocation8 + $0x60] sm:$0xff] }
  0xa6   : > { %2573 = vmatpush3.bf16.msra.mxu0 %v2570_v32  ;;  %v2582_v43 = vpack.c.bf16 %v1413_v42, %v1412_v41 }
  0xa7   : > { %1132 = vmatmul.mubr.bf16.gmra.mrb[12].mxu1 %v2736_v40  ;;  %1036 = vmatmul.mubr.bf16.gmra.mrb[12].mxu0 %v2763_v49  ;;  %v2578_v40 = vpack.c.bf16 %v1411_v38, %v1410_v37  ;;  %v2815_v49 = vld [vmem:[%s3228_s9 + $0x188] ss:$16 sps:$4 sm:$0xff]  }
  0xa8   : > { %2331 = vmatpush3.bf16.msra.mxu1 %v2738_v44  ;;  %1172 = vmatprep.mubr.bf16.mxu1 %v2746_v45  ;;  %v2812_v44 = vld [vmem:[%s3228_s9 + $0x168] ss:$16 sps:$4 sm:$0xff]   ;;  %v1414_v45 = vld [vmem:[#allocation8 + $0x70] sm:$0xff] }
  0xa9   : > { %2332 = vmatprep.subr.bf16.mxu1 %v2739_v46  ;;  %1043 = vmatprep.mubr.bf16.mxu0 %v2765_v50  ;;  %v1415_v46 = vld [vmem:[#allocation8 + $0x78] sm:$0xff] }
  0xaa   : > { %2575 = vmatprep.subr.bf16.mxu0 %v2574_v35  ;;  %v2816_v50 = vld [vmem:[%s3228_s9 + $0x1ac] ss:$16 sps:$4 sm:$0xff]  }
  0xab   : > { %2577 = vmatpush3.bf16.msra.mxu0 %v2574_v35 }
  0xac   : > { %2333 = vmatpush3.bf16.msra.mxu1 %v2740_v47  ;;  %2579 = vmatprep.subr.bf16.mxu0 %v2578_v40  ;;  %v2813_v47 = vld [vmem:[%s3228_s9 + $0x18c] ss:$16 sps:$4 sm:$0xff]  }
  0xaf   : > { %1173 = vmatmul.mubr.bf16.vlgmr.msra.gmra.mrb[16].mxu1 %v2744_v48  ;;  %1044 = vmatmul.mubr.bf16.gmra.mrb[16].mxu0 %v2769_v52  ;;  %v2586_v48 = vpack.c.bf16 %v1415_v46, %v1414_v45  ;;  %v2819_v52 = vld [vmem:[%s3228_s9 + $0x1cc] ss:$16 sps:$4 sm:$0xff]  }
  0xb0   : > { %1180 = vmatprep.mubr.bf16.mxu1 %v2749_v51  ;;  %1051 = vmatprep.mubr.bf16.mxu0 %v2771_v54  ;;  %v2818_v51 = vld [vmem:[%s3228_s9 + $0x1a8] ss:$16 sps:$4 sm:$0xff]   ;;  %v2822_v54 = vld [vmem:[%s3228_s9 + $0x1ec] ss:$16 sps:$4 sm:$0xff]  }
  0xb1   : > { %2581 = vmatpush3.bf16.msra.mxu0 %v2578_v40 }
  0xb2   : > { %2583 = vmatprep.subr.bf16.mxu0 %v2582_v43 }
  0xb5   : > { %2585 = vmatpush3.bf16.msra.mxu0 %v2582_v43 }
  0xb6   : > { %2587 = vmatprep.subr.bf16.mxu0 %v2586_v48 }
  0xb7   : > { %1181 = vmatmul.mubr.bf16.gmra.mrb[20].mxu1 %v2752_v53  ;;  %1052 = vmatmul.mubr.bf16.gmra.mrb[20].mxu0 %v2775_v56  ;;  %v2821_v53 = vld [vmem:[%s3228_s9 + $0x1c8] ss:$16 sps:$4 sm:$0xff]  }
  0xb8   : > { %1188 = vmatprep.mubr.bf16.mxu1 %v2755_v55  ;;  %1059 = vmatprep.mubr.bf16.mxu0 %v2777_v58  ;;  %v2824_v55 = vld [vmem:[%s3228_s9 + $0x1e8] ss:$16 sps:$4 sm:$0xff]  }
  0xb9   : > { %2589 = vmatpush3.bf16.msra.mxu0 %v2586_v48 }
  0xbf   : > { %1189 = vmatmul.mubr.bf16.gmra.mrb[24].mxu1 %v2758_v57  ;;  %1060 = vmatmul.mubr.bf16.gmra.mrb[24].mxu0 %v2781_v60 }
  0xc0   : > { %1196 = vmatprep.mubr.bf16.mxu1 %v2761_v59  ;;  %1067 = vmatprep.mubr.bf16.mxu0 %v2783_v62 }
  0xc7   : > { %1197 = vmatmul.mubr.bf16.gmra.mrb[28].mxu1 %v2764_v61  ;;  %1068 = vmatmul.mubr.bf16.gmra.mrb[28].mxu0 %v2787_v0 }
  0xc8   : > { %1204 = vmatprep.mubr.bf16.mxu1 %v2767_v63  ;;  %1075 = vmatprep.mubr.bf16.mxu0 %v2789_v2 }
  0xcf   : > { %1205 = vmatmul.mubr.bf16.gmra.mrb[32].mxu1 %v2770_v1  ;;  %1076 = vmatmul.mubr.bf16.gmra.mrb[32].mxu0 %v2793_v4 }
  0xd0   : > { %1212 = vmatprep.mubr.bf16.mxu1 %v2773_v3  ;;  %1083 = vmatprep.mubr.bf16.mxu0 %v2795_v6 }
  0xd7   : > { %1213 = vmatmul.mubr.bf16.gmra.mrb[36].mxu1 %v2776_v5  ;;  %1084 = vmatmul.mubr.bf16.gmra.mrb[36].mxu0 %v2799_v8 }
  0xd8   : > { %1220 = vmatprep.mubr.bf16.mxu1 %v2779_v7  ;;  %1091 = vmatprep.mubr.bf16.mxu0 %v2801_v10 }
  0xdf   : > { %1221 = vmatmul.mubr.bf16.gmra.mrb[40].mxu1 %v2782_v9  ;;  %1092 = vmatmul.mubr.bf16.gmra.mrb[40].mxu0 %v2805_v12 }
  0xe0   : > { %1228 = vmatprep.mubr.bf16.mxu1 %v2785_v11  ;;  %1099 = vmatprep.mubr.bf16.mxu0 %v2807_v14 }
  0xe7   : > { %1229 = vmatmul.mubr.bf16.gmra.mrb[44].mxu1 %v2788_v13  ;;  %1100 = vmatmul.mubr.bf16.gmra.mrb[44].mxu0 %v2811_v19 }
  0xe8   : > { %1236 = vmatprep.mubr.bf16.mxu1 %v2791_v15 }
  0xef   : > { %1237 = vmatmul.mubr.bf16.gmra.mrb[48].mxu1 %v2794_v20 }
  0xf0   : > { %1244 = vmatprep.mubr.bf16.mxu1 %v2797_v23 }
  0xf7   : > { %1245 = vmatmul.mubr.bf16.gmra.mrb[52].mxu1 %v2800_v28 }
  0xf8   : > { %1252 = vmatprep.mubr.bf16.mxu1 %v2803_v31 }
  0xff   : > { %1253 = vmatmul.mubr.bf16.gmra.mrb[56].mxu1 %v2806_v36 }
 0x100   : > { %1260 = vmatprep.mubr.bf16.mxu1 %v2809_v39 }
 0x107   : > { %1261 = vmatmul.mubr.bf16.gmra.mrb[60].mxu1 %v2812_v44 }
 0x108   : > { %1268 = vmatprep.mubr.bf16.mxu1 %v2813_v47 }
 0x10f   : > { %1269 = vmatmul.mubr.bf16.gmra.mrb[64].mxu1 %v2815_v49 }
 0x110   : > { %1276 = vmatprep.mubr.bf16.mxu1 %v2816_v50 }
 0x117   : > { %1277 = vmatmul.mubr.bf16.gmra.mrb[68].mxu1 %v2818_v51 }
 0x118   : > { %1284 = vmatprep.mubr.bf16.mxu1 %v2819_v52 }
 0x11f   : > { %1285 = vmatmul.mubr.bf16.gmra.mrb[72].mxu1 %v2821_v53 }
 0x120   : > { %1292 = vmatprep.mubr.bf16.mxu1 %v2822_v54 }
 0x127   : > { %1293 = vmatmul.mubr.bf16.gmra.mrb[76].mxu1 %v2824_v55 }
 0x162   : > { %v2294_v56 = vpop.f32.mrb[0].mxu1  ;;  %v2222_v62 = vpop.f32.mrb[0].mxu0 }
 0x163   : > { %v2295_v57 = vpop.f32.mrb[1].mxu1  ;;  %v2223_v0 = vpop.f32.mrb[1].mxu0 }
 0x164   : > { %v3302_v58 = vadd.f32 %v2295_v57, %v2294_v56  ;;  %v2297_v59 = vpop.f32.mrb[2].mxu1  ;;  %v2224_v2 = vadd.f32 %v2223_v0, %v2222_v62  ;;  %v2225_v3 = vpop.f32.mrb[2].mxu0 }
 0x165   : > { %v2298_v60 = vpop.f32.mrb[3].mxu1  ;;  %v2226_v6 = vpop.f32.mrb[3].mxu0 }
 0x166   : > { %v3304_v61 = vadd.f32 %v2298_v60, %v2297_v59  ;;  %v2227_v8 = vadd.f32 %v2226_v6, %v2225_v3 }
 0x16a   : > { %v2300_v63 = vpop.f32.mrb[4].mxu1  ;;  %v2228_v10 = vpop.f32.mrb[4].mxu0 }
 0x16b   : > { %v2301_v1 = vpop.f32.mrb[5].mxu1  ;;  %v2229_v12 = vpop.f32.mrb[5].mxu0 }
 0x16c   : > { %v3306_v4 = vadd.f32 %v2301_v1, %v2300_v63  ;;  %v2303_v5 = vpop.f32.mrb[6].mxu1  ;;  %v2230_v14 = vadd.f32 %v2229_v12, %v2228_v10  ;;  %v2231_v15 = vpop.f32.mrb[6].mxu0 }
 0x16d   : > { %v2304_v7 = vpop.f32.mrb[7].mxu1  ;;  %v2232_v18 = vpop.f32.mrb[7].mxu0 }
 0x16e   : > { %v3308_v9 = vadd.f32 %v2304_v7, %v2303_v5  ;;  %v2233_v20 = vadd.f32 %v2232_v18, %v2231_v15 }
 0x172   : > { %v2306_v11 = vpop.f32.mrb[8].mxu1  ;;  %v2234_v22 = vpop.f32.mrb[8].mxu0 }
 0x173   : > { %v2307_v13 = vpop.f32.mrb[9].mxu1  ;;  %v2235_v24 = vpop.f32.mrb[9].mxu0 }
 0x174   : > { %v3310_v16 = vadd.f32 %v2307_v13, %v2306_v11  ;;  %v2309_v17 = vpop.f32.mrb[10].mxu1  ;;  %v2236_v26 = vadd.f32 %v2235_v24, %v2234_v22  ;;  %v2237_v27 = vpop.f32.mrb[10].mxu0 }
 0x175   : > { %v2310_v19 = vpop.f32.mrb[11].mxu1  ;;  %v2238_v30 = vpop.f32.mrb[11].mxu0 }
 0x176   : > { %v3312_v21 = vadd.f32 %v2310_v19, %v2309_v17  ;;  %v2239_v32 = vadd.f32 %v2238_v30, %v2237_v27 }
 0x17a   : > { %v2312_v23 = vpop.f32.mrb[12].mxu1  ;;  %v2240_v34 = vpop.f32.mrb[12].mxu0 }
 0x17b   : > { %v2313_v25 = vpop.f32.mrb[13].mxu1  ;;  %v2241_v36 = vpop.f32.mrb[13].mxu0 }
 0x17c   : > { %v3314_v28 = vadd.f32 %v2313_v25, %v2312_v23  ;;  %v2315_v29 = vpop.f32.mrb[14].mxu1  ;;  %v2242_v38 = vadd.f32 %v2241_v36, %v2240_v34  ;;  %v2243_v39 = vpop.f32.mrb[14].mxu0 }
 0x17d   : > { %v2316_v31 = vpop.f32.mrb[15].mxu1  ;;  %v2244_v42 = vpop.f32.mrb[15].mxu0 }
 0x17e   : > { %v3316_v33 = vadd.f32 %v2316_v31, %v2315_v29  ;;  %v2245_v44 = vadd.f32 %v2244_v42, %v2243_v39 }
 0x182   : > { %v2334_v35 = vpop.f32.mrb[16].mxu1  ;;  %v2246_v48 = vpop.f32.mrb[16].mxu0 }
 0x183   : > { %v2335_v37 = vpop.f32.mrb[17].mxu1  ;;  %v2247_v50 = vpop.f32.mrb[17].mxu0 }
 0x184   : > { %v2336_v40 = vadd.f32 %v2335_v37, %v2334_v35  ;;  %v2337_v41 = vpop.f32.mrb[18].mxu1  ;;  %v2248_v52 = vadd.f32 %v2247_v50, %v2246_v48  ;;  %v2249_v53 = vpop.f32.mrb[18].mxu0 }
 0x185   : > { %v2338_v43 = vpop.f32.mrb[19].mxu1  ;;  %v2250_v56 = vpop.f32.mrb[19].mxu0 }
 0x186   : > { %v1175_v45 = vadd.f32 %v2336_v40, %v2224_v2  ;;  %v2339_v46 = vadd.f32 %v2338_v43, %v2337_v41  ;;  %v2251_v59 = vadd.f32 %v2250_v56, %v2249_v53 }
 0x188   : > { %v1178_v47 = vadd.f32 %v2339_v46, %v2227_v8  ;;  %2510 = vmatprep.mubr.f32.mxu0 %v1175_v45 }
 0x18a   : > { %v2340_v49 = vpop.f32.mrb[20].mxu1  ;;  %2511 = vmatmul.mubr.f32.vlgmr.msra.gmra.mrb[48].mxu0 %v1178_v47  ;;  %v2252_v0 = vpop.f32.mrb[20].mxu0 }
 0x18b   : > { %v2341_v51 = vpop.f32.mrb[21].mxu1  ;;  %v2253_v2 = vpop.f32.mrb[21].mxu0 }
 0x18c   : > { %v2342_v54 = vadd.f32 %v2341_v51, %v2340_v49  ;;  %v2343_v55 = vpop.f32.mrb[22].mxu1  ;;  %v2254_v5 = vadd.f32 %v2253_v2, %v2252_v0  ;;  %v2255_v6 = vpop.f32.mrb[22].mxu0 }
 0x18d   : > { %v2344_v57 = vpop.f32.mrb[23].mxu1  ;;  %v2256_v10 = vpop.f32.mrb[23].mxu0 }
 0x18e   : > { %v1183_v60 = vadd.f32 %v2342_v54, %v2230_v14  ;;  %v2345_v62 = vadd.f32 %v2344_v57, %v2343_v55  ;;  %v2257_v12 = vadd.f32 %v2256_v10, %v2255_v6 }
 0x190   : > { %v1186_v63 = vadd.f32 %v2345_v62, %v2233_v20  ;;  %2513 = vmatprep.mubr.f32.mxu0 %v1183_v60 }
 0x192   : > { %v2346_v1 = vpop.f32.mrb[24].mxu1  ;;  %2514 = vmatmul.mubr.f32.gmra.mrb[50].mxu0 %v1186_v63  ;;  %v2258_v14 = vpop.f32.mrb[24].mxu0 }
 0x193   : > { %v2347_v3 = vpop.f32.mrb[25].mxu1  ;;  %v2259_v19 = vpop.f32.mrb[25].mxu0 }
 0x194   : > { %v2348_v7 = vadd.f32 %v2347_v3, %v2346_v1  ;;  %v2349_v8 = vpop.f32.mrb[26].mxu1  ;;  %v2260_v22 = vadd.f32 %v2259_v19, %v2258_v14  ;;  %v2261_v23 = vpop.f32.mrb[26].mxu0 }
 0x195   : > { %v2350_v11 = vpop.f32.mrb[27].mxu1  ;;  %v2262_v27 = vpop.f32.mrb[27].mxu0 }
 0x196   : > { %v1191_v13 = vadd.f32 %v2348_v7, %v2236_v26  ;;  %v2351_v15 = vadd.f32 %v2350_v11, %v2349_v8  ;;  %v2263_v30 = vadd.f32 %v2262_v27, %v2261_v23 }
 0x198   : > { %v1194_v17 = vadd.f32 %v2351_v15, %v2239_v32  ;;  %2516 = vmatprep.mubr.f32.mxu0 %v1191_v13 }
 0x19a   : > { %v2352_v18 = vpop.f32.mrb[28].mxu1  ;;  %2517 = vmatmul.mubr.f32.gmra.mrb[52].mxu0 %v1194_v17  ;;  %v2264_v26 = vpop.f32.mrb[28].mxu0 }
 0x19b   : > { %v2353_v20 = vpop.f32.mrb[29].mxu1  ;;  %v2265_v32 = vpop.f32.mrb[29].mxu0 }
 0x19c   : > { %v2354_v24 = vadd.f32 %v2353_v20, %v2352_v18  ;;  %v2355_v25 = vpop.f32.mrb[30].mxu1  ;;  %v2266_v39 = vadd.f32 %v2265_v32, %v2264_v26  ;;  %v2267_v40 = vpop.f32.mrb[30].mxu0 }
 0x19d   : > { %v2356_v29 = vpop.f32.mrb[31].mxu1  ;;  %v2268_v43 = vpop.f32.mrb[31].mxu0 }
 0x19e   : > { %v1199_v31 = vadd.f32 %v2354_v24, %v2242_v38  ;;  %v2357_v34 = vadd.f32 %v2356_v29, %v2355_v25  ;;  %v2269_v46 = vadd.f32 %v2268_v43, %v2267_v40 }
 0x1a0   : > { %v1202_v35 = vadd.f32 %v2357_v34, %v2245_v44  ;;  %2519 = vmatprep.mubr.f32.mxu0 %v1199_v31 }
 0x1a2   : > { %v2358_v36 = vpop.f32.mrb[32].mxu1  ;;  %2520 = vmatmul.mubr.f32.gmra.mrb[54].mxu0 %v1202_v35  ;;  %v2270_v38 = vpop.f32.mrb[32].mxu0 }
 0x1a3   : > { %v2359_v37 = vpop.f32.mrb[33].mxu1  ;;  %v2271_v44 = vpop.f32.mrb[33].mxu0 }
 0x1a4   : > { %v2360_v41 = vadd.f32 %v2359_v37, %v2358_v36  ;;  %v2361_v42 = vpop.f32.mrb[34].mxu1  ;;  %v2272_v53 = vadd.f32 %v2271_v44, %v2270_v38  ;;  %v2273_v54 = vpop.f32.mrb[34].mxu0 }
 0x1a5   : > { %v2362_v45 = vpop.f32.mrb[35].mxu1  ;;  %v2274_v57 = vpop.f32.mrb[35].mxu0 }
 0x1a6   : > { %v1207_v47 = vadd.f32 %v2360_v41, %v2248_v52  ;;  %v2363_v48 = vadd.f32 %v2362_v45, %v2361_v42  ;;  %v2275_v62 = vadd.f32 %v2274_v57, %v2273_v54 }
 0x1a8   : > { %v1210_v49 = vadd.f32 %v2363_v48, %v2251_v59  ;;  %2522 = vmatprep.mubr.f32.mxu0 %v1207_v47 }
 0x1aa   : > { %v2364_v50 = vpop.f32.mrb[36].mxu1  ;;  %2523 = vmatmul.mubr.f32.gmra.mrb[56].mxu0 %v1210_v49  ;;  %v2276_v52 = vpop.f32.mrb[36].mxu0 }
 0x1ab   : > { %v2365_v51 = vpop.f32.mrb[37].mxu1  ;;  %v2277_v59 = vpop.f32.mrb[37].mxu0 }
 0x1ac   : > { %v2366_v55 = vadd.f32 %v2365_v51, %v2364_v50  ;;  %v2367_v56 = vpop.f32.mrb[38].mxu1  ;;  %v2278_v6 = vadd.f32 %v2277_v59, %v2276_v52  ;;  %v2279_v7 = vpop.f32.mrb[38].mxu0 }
 0x1ad   : > { %v2368_v60 = vpop.f32.mrb[39].mxu1  ;;  %v2280_v11 = vpop.f32.mrb[39].mxu0 }
 0x1ae   : > { %v1215_v63 = vadd.f32 %v2366_v55, %v2254_v5  ;;  %v2369_v0 = vadd.f32 %v2368_v60, %v2367_v56  ;;  %v2281_v15 = vadd.f32 %v2280_v11, %v2279_v7 }
 0x1b0   : > { %v1218_v1 = vadd.f32 %v2369_v0, %v2257_v12  ;;  %2525 = vmatprep.mubr.f32.mxu0 %v1215_v63 }
 0x1b2   : > { %v2370_v2 = vpop.f32.mrb[40].mxu1  ;;  %2526 = vmatmul.mubr.f32.gmra.mrb[58].mxu0 %v1218_v1  ;;  %v2282_v5 = vpop.f32.mrb[40].mxu0 }
 0x1b3   : > { %v2371_v3 = vpop.f32.mrb[41].mxu1  ;;  %v2283_v12 = vpop.f32.mrb[41].mxu0 }
 0x1b4   : > { %v2372_v8 = vadd.f32 %v2371_v3, %v2370_v2  ;;  %v2373_v10 = vpop.f32.mrb[42].mxu1  ;;  %v2284_v23 = vadd.f32 %v2283_v12, %v2282_v5  ;;  %v2285_v24 = vpop.f32.mrb[42].mxu0 }
 0x1b5   : > { %v2374_v13 = vpop.f32.mrb[43].mxu1  ;;  %v2286_v29 = vpop.f32.mrb[43].mxu0 }
 0x1b6   : > { %v1223_v17 = vadd.f32 %v2372_v8, %v2260_v22  ;;  %v2375_v14 = vadd.f32 %v2374_v13, %v2373_v10  ;;  %v2287_v34 = vadd.f32 %v2286_v29, %v2285_v24 }
 0x1b8   : > { %v1226_v18 = vadd.f32 %v2375_v14, %v2263_v30  ;;  %2528 = vmatprep.mubr.f32.mxu0 %v1223_v17 }
 0x1ba   : > { %v2376_v19 = vpop.f32.mrb[44].mxu1  ;;  %2529 = vmatmul.mubr.f32.gmra.mrb[60].mxu0 %v1226_v18  ;;  %v2288_v22 = vpop.f32.mrb[44].mxu0 }
 0x1bb   : > { %v2377_v20 = vpop.f32.mrb[45].mxu1  ;;  %v2289_v30 = vpop.f32.mrb[45].mxu0 }
 0x1bc   : > { %v2378_v25 = vadd.f32 %v2377_v20, %v2376_v19  ;;  %v2379_v27 = vpop.f32.mrb[46].mxu1  ;;  %v2290_v40 = vadd.f32 %v2289_v30, %v2288_v22  ;;  %v2291_v41 = vpop.f32.mrb[46].mxu0 }
 0x1bd   : > { %v2380_v31 = vpop.f32.mrb[47].mxu1  ;;  %v2292_v45 = vpop.f32.mrb[47].mxu0 }
 0x1be   : > { %v1231_v35 = vadd.f32 %v2378_v25, %v2266_v39  ;;  %v2381_v26 = vadd.f32 %v2380_v31, %v2379_v27  ;;  %v2293_v48 = vadd.f32 %v2292_v45, %v2291_v41 }
 0x1c0   : > { %v1234_v36 = vadd.f32 %v2381_v26, %v2269_v46  ;;  %2531 = vmatprep.mubr.f32.mxu0 %v1231_v35 }
 0x1c2   : > { %v2382_v32 = vpop.f32.mrb[48].mxu1  ;;  %2532 = vmatmul.mubr.f32.gmra.mrb[62].mxu0 %v1234_v36 }
 0x1c3   : > { %v2383_v37 = vpop.f32.mrb[49].mxu1 }
 0x1c4   : > { %v2384_v42 = vadd.f32 %v2383_v37, %v2382_v32  ;;  %v2385_v43 = vpop.f32.mrb[50].mxu1 }
 0x1c5   : > { %v2386_v47 = vpop.f32.mrb[51].mxu1 }
 0x1c6   : > { %v1239_v49 = vadd.f32 %v2384_v42, %v2272_v53  ;;  %v2387_v38 = vadd.f32 %v2386_v47, %v2385_v43 }
 0x1c8   : > { %v1242_v50 = vadd.f32 %v2387_v38, %v2275_v62  ;;  %2534 = vmatprep.mubr.f32.mxu0 %v1239_v49 }
 0x1ca   : > { %v2388_v39 = vpop.f32.mrb[52].mxu1  ;;  %2535 = vmatmul.mubr.f32.gmra.mrb[64].mxu0 %v1242_v50 }
 0x1cb   : > { %v2389_v46 = vpop.f32.mrb[53].mxu1 }
 0x1cc   : > { %v2390_v44 = vadd.f32 %v2389_v46, %v2388_v39  ;;  %v2391_v51 = vpop.f32.mrb[54].mxu1 }
 0x1cd   : > { %v2392_v54 = vpop.f32.mrb[55].mxu1 }
 0x1ce   : > { %v1247_v55 = vadd.f32 %v2390_v44, %v2278_v6  ;;  %v2393_v56 = vadd.f32 %v2392_v54, %v2391_v51 }
 0x1d0   : > { %v1250_v57 = vadd.f32 %v2393_v56, %v2281_v15  ;;  %2537 = vmatprep.mubr.f32.mxu0 %v1247_v55 }
 0x1d2   : > { %v2394_v60 = vpop.f32.mrb[56].mxu1  ;;  %2538 = vmatmul.mubr.f32.gmra.mrb[66].mxu0 %v1250_v57 }
 0x1d3   : > { %v2395_v63 = vpop.f32.mrb[57].mxu1 }
 0x1d4   : > { %v2396_v0 = vadd.f32 %v2395_v63, %v2394_v60  ;;  %v2397_v1 = vpop.f32.mrb[58].mxu1 }
 0x1d5   : > { %v2398_v52 = vpop.f32.mrb[59].mxu1 }
 0x1d6   : > { %v1255_v53 = vadd.f32 %v2396_v0, %v2284_v23  ;;  %v2399_v2 = vadd.f32 %v2398_v52, %v2397_v1 }
 0x1d8   : > { %v1258_v62 = vadd.f32 %v2399_v2, %v2287_v34  ;;  %2540 = vmatprep.mubr.f32.mxu0 %v1255_v53 }
 0x1da   : > { %v2400_v59 = vpop.f32.mrb[60].mxu1  ;;  %2541 = vmatmul.mubr.f32.gmra.mrb[68].mxu0 %v1258_v62 }
 0x1db   : > { %v2401_v3 = vpop.f32.mrb[61].mxu1 }
 0x1dc   : > { %v2402_v7 = vadd.f32 %v2401_v3, %v2400_v59  ;;  %v2403_v8 = vpop.f32.mrb[62].mxu1 }
 0x1dd   : > { %v2404_v10 = vpop.f32.mrb[63].mxu1 }
 0x1de   : > { %v1263_v6 = vadd.f32 %v2402_v7, %v2290_v40  ;;  %v2405_v11 = vadd.f32 %v2404_v10, %v2403_v8 }
 0x1e0   : > { %v1266_v13 = vadd.f32 %v2405_v11, %v2293_v48  ;;  %2543 = vmatprep.mubr.f32.mxu0 %v1263_v6 }
 0x1e2   : > { %v2406_v15 = vpop.f32.mrb[64].mxu1  ;;  %2544 = vmatmul.mubr.f32.gmra.mrb[70].mxu0 %v1266_v13 }
 0x1e3   : > { %v2407_v17 = vpop.f32.mrb[65].mxu1 }
 0x1e4   : > { %v2408_v14 = vadd.f32 %v2407_v17, %v2406_v15  ;;  %v2409_v18 = vpop.f32.mrb[66].mxu1 }
 0x1e5   : > { %v2410_v5 = vpop.f32.mrb[67].mxu1 }
 0x1e6   : > { %v1271_v19 = vadd.f32 %v2408_v14, %v3302_v58  ;;  %v2411_v12 = vadd.f32 %v2410_v5, %v2409_v18 }
 0x1e8   : > { %v1274_v20 = vadd.f32 %v2411_v12, %v3304_v61  ;;  %2546 = vmatprep.mubr.f32.mxu0 %v1271_v19 }
 0x1ea   : > { %v2412_v23 = vpop.f32.mrb[68].mxu1  ;;  %2547 = vmatmul.mubr.f32.gmra.mrb[72].mxu0 %v1274_v20 }
 0x1eb   : > { %v2413_v24 = vpop.f32.mrb[69].mxu1 }
 0x1ec   : > { %v2414_v25 = vadd.f32 %v2413_v24, %v2412_v23  ;;  %v2415_v27 = vpop.f32.mrb[70].mxu1 }
 0x1ed   : > { %v2416_v29 = vpop.f32.mrb[71].mxu1 }
 0x1ee   : > { %v1279_v31 = vadd.f32 %v2414_v25, %v3306_v4  ;;  %v2417_v34 = vadd.f32 %v2416_v29, %v2415_v27 }
 0x1f0   : > { %v1282_v35 = vadd.f32 %v2417_v34, %v3308_v9  ;;  %2549 = vmatprep.mubr.f32.mxu0 %v1279_v31 }
 0x1f2   : > { %v2418_v26 = vpop.f32.mrb[72].mxu1  ;;  %2550 = vmatmul.mubr.f32.gmra.mrb[74].mxu0 %v1282_v35 }
 0x1f3   : > { %v2419_v36 = vpop.f32.mrb[73].mxu1 }
 0x1f4   : > { %v2420_v58 = vadd.f32 %v2419_v36, %v2418_v26  ;;  %v2421_v22 = vpop.f32.mrb[74].mxu1 }
 0x1f5   : > { %v2422_v32 = vpop.f32.mrb[75].mxu1 }
 0x1f6   : > { %v1287_v61 = vadd.f32 %v2420_v58, %v3310_v16  ;;  %v2423_v30 = vadd.f32 %v2422_v32, %v2421_v22  ;;  %v3329_v16 = vld [vmem:[%s3441_s3] ss:$0 sm:$0xff] }
 0x1f8   : > { %v1290_v37 = vadd.f32 %v2423_v30, %v3312_v21  ;;  %2552 = vmatprep.mubr.f32.mxu0 %v1287_v61 }
 0x1fa   : > { %v2424_v40 = vpop.f32.mrb[76].mxu1  ;;  %2553 = vmatmul.mubr.f32.gmra.mrb[76].mxu0 %v1290_v37 }
 0x1fb   : > { %v2425_v4 = vpop.f32.mrb[77].mxu1 }
 0x1fc   : > { %v2426_v41 = vadd.f32 %v2425_v4, %v2424_v40  ;;  %v2427_v42 = vpop.f32.mrb[78].mxu1 }
 0x1fd   : > { %v2428_v9 = vpop.f32.mrb[79].mxu1 }
 0x1fe   : > { %v1295_v43 = vadd.f32 %v2426_v41, %v3314_v28  ;;  %v2429_v45 = vadd.f32 %v2428_v9, %v2427_v42 }
 0x200   : > { %v1298_v47 = vadd.f32 %v2429_v45, %v3316_v33  ;;  %2555 = vmatprep.mubr.f32.mxu0 %v1295_v43 }
 0x202   : > { %2556 = vmatmul.mubr.f32.gmra.mrb[78].mxu0 %v1298_v47 }
 0x25d   : > { %v2512_v21 = vpop.f32.mrb[48].mxu0 }
 0x25e   : > { %v1495_v48 = vadd.f32 %v2512_v21, %v3329_v16  ;;  %v1489_v49 = vpop.f32.mrb[49].mxu0 }
 0x25f   : > { %v1490_v38 = vadd.f32 %v3329_v16, %v1489_v49 }
 0x261   : > { %v2114_v50 = vpack.c.bf16 %v1495_v48, %v1490_v38 }
 0x263   : > { %2115 = vst [vmem:[%s3334_s29] sm:$0xff] %v2114_v50  }
 0x265   : > { %v2515_v28 = vpop.f32.mrb[50].mxu0 }
 0x266   : > { %v1505_v33 = vadd.f32 %v2515_v28, %v3329_v16  ;;  %v1499_v39 = vpop.f32.mrb[51].mxu0 }
 0x267   : > { %v1500_v46 = vadd.f32 %v3329_v16, %v1499_v39 }
 0x269   : > { %v2119_v44 = vpack.c.bf16 %v1505_v33, %v1500_v46 }
 0x26b   : > { %2191 = vst [vmem:[%s3334_s29 + $0x8] sm:$0xff] %v2119_v44  }
 0x26d   : > { %v2518_v51 = vpop.f32.mrb[52].mxu0 }
 0x26e   : > { %v1515_v54 = vadd.f32 %v2518_v51, %v3329_v16  ;;  %v1509_v55 = vpop.f32.mrb[53].mxu0 }
 0x26f   : > { %v1510_v56 = vadd.f32 %v3329_v16, %v1509_v55 }
 0x271   : > { %v2124_v57 = vpack.c.bf16 %v1515_v54, %v1510_v56 }
 0x273   : > { %2192 = vst [vmem:[%s3334_s29 + $0x10] sm:$0xff] %v2124_v57  }
 0x275   : > { %v2521_v60 = vpop.f32.mrb[54].mxu0 }
 0x276   : > { %v1525_v63 = vadd.f32 %v2521_v60, %v3329_v16  ;;  %v1519_v0 = vpop.f32.mrb[55].mxu0 }
 0x277   : > { %v1520_v1 = vadd.f32 %v3329_v16, %v1519_v0 }
 0x279   : > { %v2129_v52 = vpack.c.bf16 %v1525_v63, %v1520_v1 }
 0x27b   : > { %2193 = vst [vmem:[%s3334_s29 + $0x18] sm:$0xff] %v2129_v52  }
 0x27d   : > { %v2524_v53 = vpop.f32.mrb[56].mxu0 }
 0x27e   : > { %v1535_v2 = vadd.f32 %v2524_v53, %v3329_v16  ;;  %v1529_v62 = vpop.f32.mrb[57].mxu0 }
 0x27f   : > { %v1530_v59 = vadd.f32 %v3329_v16, %v1529_v62 }
 0x281   : > { %v2134_v3 = vpack.c.bf16 %v1535_v2, %v1530_v59 }
 0x283   : > { %2194 = vst [vmem:[%s3334_s29 + $0x20] sm:$0xff] %v2134_v3  }
 0x285   : > { %v2527_v7 = vpop.f32.mrb[58].mxu0 }
 0x286   : > { %v1545_v8 = vadd.f32 %v2527_v7, %v3329_v16  ;;  %v1539_v10 = vpop.f32.mrb[59].mxu0 }
 0x287   : > { %v1540_v6 = vadd.f32 %v3329_v16, %v1539_v10 }
 0x289   : > { %v2139_v11 = vpack.c.bf16 %v1545_v8, %v1540_v6 }
 0x28b   : > { %2195 = vst [vmem:[%s3334_s29 + $0x28] sm:$0xff] %v2139_v11  }
 0x28d   : > { %v2530_v13 = vpop.f32.mrb[60].mxu0 }
 0x28e   : > { %v1555_v15 = vadd.f32 %v2530_v13, %v3329_v16  ;;  %v1549_v17 = vpop.f32.mrb[61].mxu0 }
 0x28f   : > { %v1550_v14 = vadd.f32 %v3329_v16, %v1549_v17 }
 0x291   : > { %v2144_v18 = vpack.c.bf16 %v1555_v15, %v1550_v14 }
 0x293   : > { %2196 = vst [vmem:[%s3334_s29 + $0x30] sm:$0xff] %v2144_v18  }
 0x295   : > { %v2533_v5 = vpop.f32.mrb[62].mxu0 }
 0x296   : > { %v1565_v19 = vadd.f32 %v2533_v5, %v3329_v16  ;;  %v1559_v12 = vpop.f32.mrb[63].mxu0 }
 0x297   : > { %v1560_v20 = vadd.f32 %v3329_v16, %v1559_v12 }
 0x299   : > { %v2149_v23 = vpack.c.bf16 %v1565_v19, %v1560_v20 }
 0x29b   : > { %2197 = vst [vmem:[%s3334_s29 + $0x38] sm:$0xff] %v2149_v23  }
 0x29d   : > { %v2536_v24 = vpop.f32.mrb[64].mxu0 }
 0x29e   : > { %v1575_v25 = vadd.f32 %v2536_v24, %v3329_v16  ;;  %v1569_v27 = vpop.f32.mrb[65].mxu0 }
 0x29f   : > { %v1570_v29 = vadd.f32 %v3329_v16, %v1569_v27 }
 0x2a1   : > { %v2154_v31 = vpack.c.bf16 %v1575_v25, %v1570_v29 }
 0x2a3   : > { %2198 = vst [vmem:[%s3334_s29 + $0x40] sm:$0xff] %v2154_v31  }
 0x2a5   : > { %v2539_v34 = vpop.f32.mrb[66].mxu0 }
 0x2a6   : > { %v1585_v35 = vadd.f32 %v2539_v34, %v3329_v16  ;;  %v1579_v26 = vpop.f32.mrb[67].mxu0 }
 0x2a7   : > { %v1580_v36 = vadd.f32 %v3329_v16, %v1579_v26 }
 0x2a9   : > { %v2159_v58 = vpack.c.bf16 %v1585_v35, %v1580_v36 }
 0x2ab   : > { %2199 = vst [vmem:[%s3334_s29 + $0x48] sm:$0xff] %v2159_v58  }
 0x2ad   : > { %v2542_v22 = vpop.f32.mrb[68].mxu0 }
 0x2ae   : > { %v1595_v32 = vadd.f32 %v2542_v22, %v3329_v16  ;;  %v1589_v61 = vpop.f32.mrb[69].mxu0 }
 0x2af   : > { %v1590_v30 = vadd.f32 %v3329_v16, %v1589_v61 }
 0x2b1   : > { %v2164_v37 = vpack.c.bf16 %v1595_v32, %v1590_v30 }
 0x2b3   : > { %2200 = vst [vmem:[%s3334_s29 + $0x50] sm:$0xff] %v2164_v37  }
 0x2b5   : > { %v2545_v40 = vpop.f32.mrb[70].mxu0 }
 0x2b6   : > { %v1605_v4 = vadd.f32 %v2545_v40, %v3329_v16  ;;  %v1599_v41 = vpop.f32.mrb[71].mxu0 }
 0x2b7   : > { %v1600_v42 = vadd.f32 %v3329_v16, %v1599_v41 }
 0x2b9   : > { %v2169_v9 = vpack.c.bf16 %v1605_v4, %v1600_v42 }
 0x2bb   : > { %2201 = vst [vmem:[%s3334_s29 + $0x58] sm:$0xff] %v2169_v9  }
 0x2bd   : > { %v2548_v43 = vpop.f32.mrb[72].mxu0 }
 0x2be   : > { %v1615_v45 = vadd.f32 %v2548_v43, %v3329_v16  ;;  %v1609_v47 = vpop.f32.mrb[73].mxu0 }
 0x2bf   : > { %v1610_v21 = vadd.f32 %v3329_v16, %v1609_v47 }
 0x2c1   : > { %v2174_v48 = vpack.c.bf16 %v1615_v45, %v1610_v21 }
 0x2c3   : > { %2202 = vst [vmem:[%s3334_s29 + $0x60] sm:$0xff] %v2174_v48  }
 0x2c5   : > { %v2551_v49 = vpop.f32.mrb[74].mxu0 }
 0x2c6   : > { %v1625_v38 = vadd.f32 %v2551_v49, %v3329_v16  ;;  %v1619_v50 = vpop.f32.mrb[75].mxu0 }
 0x2c7   : > { %v1620_v28 = vadd.f32 %v3329_v16, %v1619_v50 }
 0x2c9   : > { %v2179_v33 = vpack.c.bf16 %v1625_v38, %v1620_v28 }
 0x2cb   : > { %2203 = vst [vmem:[%s3334_s29 + $0x68] sm:$0xff] %v2179_v33  }
 0x2cd   : > { %v2554_v39 = vpop.f32.mrb[76].mxu0 }
 0x2ce   : > { %v1635_v46 = vadd.f32 %v2554_v39, %v3329_v16  ;;  %v1629_v44 = vpop.f32.mrb[77].mxu0 }
 0x2cf   : > { %v1630_v51 = vadd.f32 %v3329_v16, %v1629_v44 }
 0x2d1   : > { %v2184_v54 = vpack.c.bf16 %v1635_v46, %v1630_v51 }
 0x2d3   : > { %2204 = vst [vmem:[%s3334_s29 + $0x70] sm:$0xff] %v2184_v54  }
 0x2d5   : > { %v2557_v55 = vpop.f32.mrb[78].mxu0 }
 0x2d6   : > { %v1645_v56 = vadd.f32 %v2557_v55, %v3329_v16  ;;  %v1639_v57 = vpop.f32.mrb[79].mxu0 }
 0x2d7   : > { %v1640_v60 = vadd.f32 %v3329_v16, %v1639_v57 }
 0x2d9   : > { %v2189_v63 = vpack.c.bf16 %v1645_v56, %v1640_v60 }
 0x2db   : > { %2205 = vst [vmem:[%s3334_s29 + $0x78] sm:$0xff] %v2189_v63  }
 0x2dc   : > { %2924 = shalt.err (!%p2921_p11)
}
 0x2dd   : > { %s2925_s12 = scalar_lea.hbm %s3386_s24, 2048  ;;  %s2929_s25 = scalar_lea.hbm %s3442_s4, 4096 }
 0x2de   : > { %p2926_p0 = scmp.ne.s32.totalorder %s3386_s24, %s2925_s12  ;;  %p2930_p6 = scmp.lt.u32.totalorder %s3386_s24, %s3442_s4 }
 0x2df   : > { %p2931_p7 = scmp.lt.u32.totalorder %s2929_s25, %s2925_s12  ;;  %p2933_p8 = scmp.lt.u32.totalorder %s2925_s12, %s3386_s24 }
 0x2e0   : > { %p2927_p4 = pnand %p2926_p0, %p3457_p12 }
 0x2e1   : > { %p2932_p2 = por %p2931_p7, %p2930_p6 }
 0x2e2   : > { %p2928_p13 = pneg %p2927_p4 }
 0x2e3   : > { %p2934_p1 = por %p2933_p8, %p2932_p2 }
 0x2e5   : > { %p2935_p10 = pnand %p2934_p1, %p2928_p13 }
 0x2e7   : > { %2938 = shalt.err (!%p2935_p10)
}
 0x2e8   : > { %s3009_s14 = smov 64   ;;  %s3010_s22 = smov 4  }
 0x2e9   : > { %2616 = dma.vmem_to_hbm [thread:$0]  (%p3457_p12), %s3388_s21, 2048, %s3386_s24, %s1809_s7, %s3009_s14, %s3009_s14, %s3010_s22  }
 0x2ea PF: > { %s1837_s13 = sand.u32 1, %s2977_s15   ;;  %p3458_p3 = scmp.ne.s32.totalorder %s3450_s26, 0 }
 0x2eb   : > { %p3459_p5 = scmp.ge.s32.totalorder %s2997_s20, 2  ;;  %s1838_s18 = scalar_lea.sflag [#allocation5], %s1837_s13 }
 0x2ed   : > { %p2630_p9 = pnand %p3459_p5, %p3458_p3 }
 0x2ef   : > { %2972 = dma.done.wait (!%p2630_p9), %s1838_s18, 2048  }
 0x2f0   : > { %2974 = vsyncadd (!%p2630_p9), %s1838_s18, 4294965248  ;;  %s21_s20 = sadd.s32 1, %s2997_s20   ;;  %s3460_s15 = smov %s2981_s16 }
 0x2f1   : > { %p18_p11 = scmp.ge.s32.totalorder %s21_s20, 4   ;;  %s3461_s16 = smov %s2985_s17 }
 0x2f2   : > { %s3462_s17 = smov %s3178_s11  ;;  %s3463_s18 = smov %s2993_s19 }
 0x2f3   : > { %s3464_s19 = smov %s3466_s5  ;;  %20 = sbr.rel (!%p18_p11) target bundleno = 7 (0x7), region = 98 }
 0x2fa   :  { %1843 = vsyncpa [#allocation4], 1 }
 0x2fb   :  { %1845 = vsyncpa [#allocation4 + $0x1], 1 }
 0x2fc   :  { %1846 = vsyncpa [#allocation7], 1 }
 0x2fd   :  { %1847 = vsyncpa [#allocation5], 1 }
 0x2fe   :  { %1849 = vsyncpa [#allocation5 + $0x1], 1 }

</bundles_post_ra>
